<compile_context>
chip_gen: v7x
topology: tpu7x:2x2x1
jax: 0.10.0
libtpu: 0.0.40
codegen_flags: <defaults>
</compile_context>

<pallas_src>
import functools

import jax
import jax.numpy as jnp
from jax.experimental import pallas as pl
from jax.experimental.pallas import tpu as pltpu


# ---------------------------------------------------------------------------
# Kernels
# ---------------------------------------------------------------------------
def _attention_body(q, k, v, mask, out_ref, att_ref, scale):
    """q: (TB, TQ, D); k, v: (TB, S1, D); mask: (TB, TQ, S1) int8 or None."""
    inv_scale = jnp.asarray(1.0 / scale, dtype=q.dtype)

    # scores = (q / scale) @ k^T as a batched dot_general contracting on K's
    # last dim (no explicit transpose / VMEM relayout); f32 accumulation.
    scores = jax.lax.dot_general(
        q * inv_scale, k,
        dimension_numbers=(((2,), (2,)), ((0,), (0,))),
        preferred_element_type=jnp.float32)                     # (TB, TQ, S1) f32

    if mask is not None:
        scores = jnp.where(mask != 0, -jnp.inf, scores)

    # Numerically stable softmax over the last axis (f32 math).
    row_max = jnp.max(scores, axis=-1, keepdims=True)
    exps = jnp.exp(scores - row_max)
    denom = jnp.sum(exps, axis=-1, keepdims=True)
    att = exps * pl.reciprocal(denom)                           # (TB, TQ, S1) f32

    # TODO(synk): nn.Dropout(p=0.1) is identity in eval mode; training-mode
    # dropout (pltpu.prng_*) intentionally omitted.

    out = jax.lax.dot_general(
        att.astype(v.dtype), v,
        dimension_numbers=(((2,), (1,)), ((0,), (0,))),
        preferred_element_type=jnp.float32)                     # (TB, TQ, D) f32

    out_ref[...] = out.astype(out_ref.dtype)
    att_ref[...] = att.astype(att_ref.dtype)


def _attention_kernel_masked(q_ref, k_ref, v_ref, m_ref, out_ref, att_ref, *, scale):
    _attention_body(q_ref[...], k_ref[...], v_ref[...], m_ref[...],
                    out_ref, att_ref, scale)


def _attention_kernel_nomask(q_ref, k_ref, v_ref, out_ref, att_ref, *, scale):
    _attention_body(q_ref[...], k_ref[...], v_ref[...], None,
                    out_ref, att_ref, scale)


# ---------------------------------------------------------------------------
# Block-size selection helpers
# ---------------------------------------------------------------------------
def _largest_divisor_leq(n, cap):
    cap = max(1, min(n, cap))
    for t in range(cap, 0, -1):
        if n % t == 0:
            return t
    return 1


def _pick_block(total, cap):
    """Largest block that divides `total`, is <= cap, and is either the full
    extent or a multiple of 8 (TPU sublane constraint on tiled dims)."""
    if total <= cap:
        return total
    best = None
    for t in range(8, cap + 1, 8):
        if total % t == 0:
            best = t
    return best if best is not None else total


# ---------------------------------------------------------------------------
# Wrapper
# ---------------------------------------------------------------------------
def attention(query, key, value, mask=None, *, dim=None,
              block_bh=None, block_q=None):
    """Returns (output (BH, S2, D), att_score (BH, S2, S1)), dtype = query.dtype."""
    bh, s2, d = query.shape
    _, s1, _ = key.shape
    if dim is None:
        dim = d
    scale = float(dim) ** 0.5
    has_mask = mask is not None
    out_dtype = query.dtype

    # --- pick query-axis tile ---
    if block_q is None:
        block_q = _pick_block(s2, 256)
    q_steps = s2 // block_q

    # --- pick batch*head tile; keep grid length >= 2 so both v7x TCs get work ---
    if block_bh is None:
        cap = 8
        if q_steps == 1 and bh >= 2:
            cap = min(cap, bh // 2)
        block_bh = _largest_divisor_leq(bh, max(1, cap))

    # --- conservative VMEM budget (fits v5e's 16 MiB default scoped VMEM,
    #     leaves headroom on v7x's 64 MiB physical VMEM) ---
    in_item = jnp.dtype(query.dtype).itemsize
    out_item = jnp.dtype(out_dtype).itemsize

    def _vmem_bytes(tb, tq):
        q_b = tb * tq * d * in_item
        kv_b = 2 * tb * s1 * d * in_item
        m_b = tb * tq * s1 if has_mask else 0
        o_b = tb * tq * d * out_item
        a_b = tb * tq * s1 * out_item
        f32_tmp = 2 * tb * tq * s1 * 4          # scores / exps intermediates
        return 2 * (q_b + kv_b + m_b + o_b + a_b) + f32_tmp  # x2: double-buffering

    vmem_budget = 12 * 1024 * 1024
    while _vmem_bytes(block_bh, block_q) > vmem_budget:
        if block_q > 8:
            new_q = _pick_block(s2, block_q // 2)
            if new_q < block_q:
                block_q = new_q
                continue
        if block_bh > 1:
            new_b = _largest_divisor_leq(bh, block_bh // 2)
            if new_b < block_bh:
                block_bh = new_b
                continue
        break  # cannot shrink further

    grid = (bh // block_bh, s2 // block_q)

    kernel = functools.partial(
        _attention_kernel_masked if has_mask else _attention_kernel_nomask,
        scale=scale)

    in_specs = [
        pl.BlockSpec((block_bh, block_q, d), lambda b, i: (b, i, 0)),   # q
        pl.BlockSpec((block_bh, s1, d), lambda b, i: (b, 0, 0)),        # k (resident across q tiles)
        pl.BlockSpec((block_bh, s1, d), lambda b, i: (b, 0, 0)),        # v (resident across q tiles)
    ]
    operands = [query, key, value]
    if has_mask:
        mask_i8 = (jnp.broadcast_to(mask, (bh, s2, s1)) != 0).astype(jnp.int8)
        in_specs.append(pl.BlockSpec((block_bh, block_q, s1), lambda b, i: (b, i, 0)))
        operands.append(mask_i8)

    out, att = pl.pallas_call(
        kernel,
        out_shape=(
            jax.ShapeDtypeStruct((bh, s2, d), out_dtype),
            jax.ShapeDtypeStruct((bh, s2, s1), out_dtype),
        ),
        grid_spec=pltpu.PrefetchScalarGridSpec(
            num_scalar_prefetch=0,
            grid=grid,
            in_specs=in_specs,
            out_specs=[
                pl.BlockSpec((block_bh, block_q, d), lambda b, i: (b, i, 0)),
                pl.BlockSpec((block_bh, block_q, s1), lambda b, i: (b, i, 0)),
            ],
        ),
        compiler_params=pltpu.CompilerParams(
            dimension_semantics=("parallel", "parallel")),
    )(*operands)
    return out, att


# ---------------------------------------------------------------------------
# Demo / correctness check
# ---------------------------------------------------------------------------
if __name__ == "__main__":
    # Small shapes consistent with the module: B=2, h=2 -> BH=4, S=8, dim=32.
    B, H, S, D = 2, 2, 8, 32
    BH = B * H
    key_rng = jax.random.PRNGKey(0)
    kq, kk, kv = jax.random.split(key_rng, 3)

    query = jax.random.normal(kq, (BH, S, D), jnp.float32)
    key_ = jax.random.normal(kk, (BH, S, D), jnp.float32)
    value = jax.random.normal(kv, (BH, S, D), jnp.float32)

    # Strictly-upper-triangular causal mask (True = masked), broadcast over heads.
    causal = jnp.triu(jnp.ones((S, S), jnp.bool_), k=1)
    mask = jnp.broadcast_to(causal, (BH, S, S))

    out, att = attention(query, key_, value, mask, dim=D)
    jax.block_until_ready((out, att))

    # Pure-JAX reference (same math, eval-mode dropout).
    scale = D ** 0.5
    scores = jnp.einsum("bqd,bkd->bqk", query / scale, key_)
    scores = jnp.where(mask, -jnp.inf, scores)
    att_ref = jax.nn.softmax(scores, axis=-1)
    out_ref = jnp.einsum("bqk,bkd->bqd", att_ref, value)
    assert jnp.allclose(att, att_ref, atol=1e-5, rtol=1e-5)
    assert jnp.allclose(out, out_ref, atol=1e-5, rtol=1e-5)

    # mask=None path (no mask tensor streamed at all).
    out2, att2 = attention(query, key_, value, None, dim=D)
    jax.block_until_ready((out2, att2))
    att_ref2 = jax.nn.softmax(jnp.einsum("bqd,bkd->bqk", query / scale, key_), axis=-1)
    out_ref2 = jnp.einsum("bqk,bkd->bqd", att_ref2, value)
    assert jnp.allclose(att2, att_ref2, atol=1e-5, rtol=1e-5)
    assert jnp.allclose(out2, out_ref2, atol=1e-5, rtol=1e-5)

    print("KERNEL_OK")
</pallas_src>

<mosaic_0001>
module attributes {stable_mosaic.version = 11 : i64} {
  func.func @_attention_kernel_masked(%arg0: i32, %arg1: i32, %arg2: memref<2x8x32xf32, #tpu.memory_space<vmem>>, %arg3: memref<2x8x32xf32, #tpu.memory_space<vmem>>, %arg4: memref<2x8x32xf32, #tpu.memory_space<vmem>>, %arg5: memref<2x8x8xi8, #tpu.memory_space<vmem>>, %arg6: memref<2x8x32xf32, #tpu.memory_space<vmem>>, %arg7: memref<2x8x8xf32, #tpu.memory_space<vmem>>) attributes {dimension_semantics = [#tpu.dimension_semantics<parallel>, #tpu.dimension_semantics<parallel>], iteration_bounds = array<i64: 2, 1>, scalar_prefetch = 0 : i64, scratch_operands = 0 : i64, tpu.core_type = #tpu.core_type<tc>, window_params = [{transform_indices = @transform_0, window_bounds = array<i64: 2, 8, 32>}, {transform_indices = @transform_1, window_bounds = array<i64: 2, 8, 32>}, {transform_indices = @transform_2, window_bounds = array<i64: 2, 8, 32>}, {transform_indices = @transform_3, window_bounds = array<i64: 2, 8, 8>}, {transform_indices = @transform_4, window_bounds = array<i64: 2, 8, 32>}, {transform_indices = @transform_5, window_bounds = array<i64: 2, 8, 8>}]} {
    %c0 = arith.constant 0 : index
    %c0_0 = arith.constant 0 : index
    %c0_1 = arith.constant 0 : index
    %0 = vector.load %arg2[%c0, %c0_0, %c0_1] : memref<2x8x32xf32, #tpu.memory_space<vmem>>, vector<2x8x32xf32>
    %c0_2 = arith.constant 0 : index
    %c0_3 = arith.constant 0 : index
    %c0_4 = arith.constant 0 : index
    %1 = vector.load %arg3[%c0_2, %c0_3, %c0_4] : memref<2x8x32xf32, #tpu.memory_space<vmem>>, vector<2x8x32xf32>
    %c0_5 = arith.constant 0 : index
    %c0_6 = arith.constant 0 : index
    %c0_7 = arith.constant 0 : index
    %2 = vector.load %arg4[%c0_5, %c0_6, %c0_7] : memref<2x8x32xf32, #tpu.memory_space<vmem>>, vector<2x8x32xf32>
    %c0_8 = arith.constant 0 : index
    %c0_9 = arith.constant 0 : index
    %c0_10 = arith.constant 0 : index
    %3 = vector.load %arg5[%c0_8, %c0_9, %c0_10] : memref<2x8x8xi8, #tpu.memory_space<vmem>>, vector<2x8x8xi8>
    %cst = arith.constant 0.176776692 : f32
    %4 = vector.broadcast %cst : f32 to vector<2x8x32xf32>
    %5 = arith.mulf %0, %4 : vector<2x8x32xf32>
    %cst_11 = arith.constant dense<0.000000e+00> : vector<2x8x8xf32>
    %6 = tpu.matmul %5, %1, %cst_11 {dimension_numbers = #tpu.dot_dimension_numbers<[2], [2], [1], [1], [0, 0, 0, 1, 1, 1], [0], [0]>} : vector<2x8x32xf32>, vector<2x8x32xf32>, vector<2x8x8xf32> -> vector<2x8x8xf32>
    %c0_i8 = arith.constant 0 : i8
    %7 = vector.broadcast %c0_i8 : i8 to vector<2x8x8xi8>
    %8 = arith.cmpi ne, %3, %7 : vector<2x8x8xi8>
    %cst_12 = arith.constant 0xFF800000 : f32
    %9 = vector.broadcast %cst_12 : f32 to vector<2x8x8xf32>
    %10 = arith.select %8, %9, %6 : vector<2x8x8xi1>, vector<2x8x8xf32>
    %cst_13 = arith.constant dense<0xFF800000> : vector<2x8xf32>
    %11 = vector.multi_reduction <maximumf>, %10, %cst_13 [2] : vector<2x8x8xf32> to vector<2x8xf32>
    %12 = vector.shape_cast %11 : vector<2x8xf32> to vector<2x8x1xf32>
    %13 = vector.broadcast %12 : vector<2x8x1xf32> to vector<2x8x8xf32>
    %14 = arith.subf %10, %13 : vector<2x8x8xf32>
    %15 = math.exp %14 : vector<2x8x8xf32>
    %cst_14 = arith.constant dense<0.000000e+00> : vector<2x8xf32>
    %16 = vector.multi_reduction <add>, %15, %cst_14 [2] : vector<2x8x8xf32> to vector<2x8xf32>
    %17 = vector.shape_cast %16 : vector<2x8xf32> to vector<2x8x1xf32>
    %18 = tpu.reciprocal %17 : vector<2x8x1xf32> -> vector<2x8x1xf32>
    %19 = vector.broadcast %18 : vector<2x8x1xf32> to vector<2x8x8xf32>
    %20 = arith.mulf %15, %19 : vector<2x8x8xf32>
    %cst_15 = arith.constant dense<0.000000e+00> : vector<2x8x32xf32>
    %21 = tpu.matmul %20, %2, %cst_15 {dimension_numbers = #tpu.dot_dimension_numbers<[2], [1], [1], [2], [0, 0, 0, 1, 1, 2], [0], [0]>} : vector<2x8x8xf32>, vector<2x8x32xf32>, vector<2x8x32xf32> -> vector<2x8x32xf32>
    %c0_16 = arith.constant 0 : index
    %c0_17 = arith.constant 0 : index
    %c0_18 = arith.constant 0 : index
    %22 = vector.load %arg6[%c0_16, %c0_17, %c0_18] : memref<2x8x32xf32, #tpu.memory_space<vmem>>, vector<2x8x32xf32>
    tpu.vector_store %arg6[%c0_16, %c0_17, %c0_18], %21 {strides = array<i32>} : memref<2x8x32xf32, #tpu.memory_space<vmem>>, vector<2x8x32xf32>,
    %c0_19 = arith.constant 0 : index
    %c0_20 = arith.constant 0 : index
    %c0_21 = arith.constant 0 : index
    %23 = vector.load %arg7[%c0_19, %c0_20, %c0_21] : memref<2x8x8xf32, #tpu.memory_space<vmem>>, vector<2x8x8xf32>
    tpu.vector_store %arg7[%c0_19, %c0_20, %c0_21], %20 {strides = array<i32>} : memref<2x8x8xf32, #tpu.memory_space<vmem>>, vector<2x8x8xf32>,
    return
  }
  func.func @transform_0(%arg0: i32, %arg1: i32) -> (i32, i32, i32) {
    %c0_i32 = arith.constant 0 : i32
    %c0_i32_0 = arith.constant 0 : i32
    return %arg0, %arg1, %c0_i32 : i32, i32, i32
  }
  func.func @transform_1(%arg0: i32, %arg1: i32) -> (i32, i32, i32) {
    %c0_i32 = arith.constant 0 : i32
    %c0_i32_0 = arith.constant 0 : i32
    %c0_i32_1 = arith.constant 0 : i32
    return %arg0, %c0_i32, %c0_i32_0 : i32, i32, i32
  }
  func.func @transform_2(%arg0: i32, %arg1: i32) -> (i32, i32, i32) {
    %c0_i32 = arith.constant 0 : i32
    %c0_i32_0 = arith.constant 0 : i32
    %c0_i32_1 = arith.constant 0 : i32
    return %arg0, %c0_i32, %c0_i32_0 : i32, i32, i32
  }
  func.func @transform_3(%arg0: i32, %arg1: i32) -> (i32, i32, i32) {
    %c0_i32 = arith.constant 0 : i32
    %c0_i32_0 = arith.constant 0 : i32
    return %arg0, %arg1, %c0_i32 : i32, i32, i32
  }
  func.func @transform_4(%arg0: i32, %arg1: i32) -> (i32, i32, i32) {
    %c0_i32 = arith.constant 0 : i32
    %c0_i32_0 = arith.constant 0 : i32
    return %arg0, %arg1, %c0_i32 : i32, i32, i32
  }
  func.func @transform_5(%arg0: i32, %arg1: i32) -> (i32, i32, i32) {
    %c0_i32 = arith.constant 0 : i32
    %c0_i32_0 = arith.constant 0 : i32
    return %arg0, %arg1, %c0_i32 : i32, i32, i32
  }
}

</mosaic_0001>

<bundles_post_ra>
// kernel: tpu_custom_call.1
= control target key start
LH: loop header
LB: loop body
LE: loop exit
PB: predicated region body
PF: predicated region fallthrough
CT: control target
= control target key end

     0   :  { %s1710_s0 = inlined_call_operand.hbm [shape: f32[4,8,32], index: 0, kind: input, shape index: {}]   ;;  %s1711_s1 = inlined_call_operand.hbm [shape: f32[4,8,32], index: 1, kind: input, shape index: {}]   ;;  %s1712_s2 = inlined_call_operand.hbm [shape: f32[4,8,32], index: 2, kind: input, shape index: {}]   ;;  %s1713_s3 = inlined_call_operand.vmem [shape: s8[4,8,8], index: 3, kind: input, shape index: {}]   ;;  %s1714_s4 = inlined_call_operand.hbm [shape: f32[4,8,32], index: 4, kind: output, shape index: {0}]   ;;  %s1715_s5 = inlined_call_operand.hbm [shape: f32[4,8,8], index: 5, kind: output, shape index: {1}]  }
   0x1   :  { %1728 = sst [smem:[#allocation20_spill]] %s1711_s1 }
   0x2   :  { %11 = vsyncpa [#allocation3], 0 }
   0x3   :  { %13 = vsyncpa [#allocation3 + $0x1], 0 }
   0x4   :  { %14 = vsyncpa [#allocation6], 0 }
   0x5   :  { %16 = vsyncpa [#allocation6 + $0x1], 0 }
   0x6   :  { %17 = vsyncpa [#allocation4], 0 }
   0x7   :  { %19 = vsyncpa [#allocation4 + $0x1], 0 }
   0x8   :  { %20 = vsyncpa [#allocation10], 0 }
   0x9   :  { %22 = vsyncpa [#allocation10 + $0x1], 0  ;;  %s1362_s18 = smov 0   ;;  %s1364_s19 = smov 0  }
   0xa   :  { %s1366_s20 = smov 0   ;;  %s1368_s21 = smov 0  }
   0xb   :  { %s1370_s22 = smov 0   ;;  %s1372_s23 = smov 0  }
   0xc LB: > { %1729 = sst [smem:[#allocation15_spill]] %s1314_s22  ;;  %s1393_s24 = sadd.s32 4294967295, %s1318_s23   ;;  %s1318_s23 = sphi %s1372_s23, %s28_s23   ;;  %s1314_s22 = sphi %s1370_s22, %s1756_s22   ;;  %s1310_s21 = sphi %s1368_s21, %s1755_s21   ;;  %s1306_s20 = sphi %s1366_s20, %s1759_s20   ;;  %s1302_s19 = sphi %s1364_s19, %s1758_s19   ;;  %s1298_s18 = sphi %s1362_s18, %s1757_s18  }
   0xd   : > { %1730 = sst [smem:[#allocation16_spill]] %s1318_s23  ;;  %s951_s25 = sadd.s32 4294967294, %s1318_s23  }
   0xe   : > { %s40_s26 = sadd.s32 1, %s1314_s22  ;;  %s49_s27 = sadd.s32 1, %s1306_s20 }
   0xf   : > { %p42_p0 = scmp.ge.s32.totalorder %s40_s26, 2  ;;  %p56_p1 = scmp.ne.s32.totalorder %s1306_s20, %s1302_s19 }
  0x10   : > { %p57_p2 = scmp.eq.s32.totalorder %s1318_s23, 0  ;;  %p62_p3 = scmp.ne.s32.totalorder %s1302_s19, %s1298_s18 }
  0x11   : > { %s1761_s26 = smov (%p42_p0, %s40_s26), 0  ;;  %p63_p5 = scmp.eq.s32.totalorder %s1393_s24, 0 }
  0x12   : > { %1731 = sst [smem:[#allocation17_spill]] %s1761_s26  ;;  %p1405_p4 = por %p57_p2, %p56_p1 }
  0x13   : > { %s44_s29 = ssub.s32 %s1314_s22, %s1761_s26  ;;  %p168_p6 = scmp.eq.s32.totalorder %s1393_s24, 1 }
  0x14   : > { %p47_p7 = scmp.eq.s32.totalorder %s44_s29, 0  ;;  %p1413_p8 = por %p63_p5, %p62_p3 }
  0x15   : > { %p1417_p9 = por %p168_p6, %p56_p1  ;;  %p174_p10 = scmp.eq.s32.totalorder %s951_s25, 1 }
  0x16   : > { %s1733_s30 = scalar_select %p1413_p8, 1, 0 }
  0x17   : > { %s1734_s6 = scalar_select %p1417_p9, 1, 0 }
  0x18   : > { %s1422_s7 = scalar_select %p47_p7, %s1306_s20, %s49_s27  }
  0x19   : > { %p1424_p11 = por %p174_p10, %p62_p3  ;;  %p1045_p13 = scmp.lt.s32.totalorder %s1318_s23, 2 }
  0x1a   : > { %1735 = sst [smem:[#allocation18_spill]] %s1422_s7  ;;  %s1716_s9 = sand.u32 1, %s1306_s20  }
  0x1b   : > { %s1736_s8 = scalar_select %p1424_p11, 1, 0 }
  0x1c   : > { %s1433_s10 = sshll.u32 %s1716_s9, 4  ;;  %s1436_s11 = sshll.u32 %s1314_s22, 8 }
  0x1d   : > { %1737 = sst [smem:[#allocation19_spill]] %s1736_s8  ;;  %p1440_p0 = pnand %p1045_p13, %p1405_p4 }
  0x1e   : > { %s244_s13 = sand.u32 1, %s1318_s23   ;;  %s1739_s1 = sld [smem:[#allocation20_spill]] }
  0x1f   : > { %s248_s17 = scalar_lea.vmem [#allocation5], %s1433_s10  ;;  %s1456_s27 = scalar_lea.sflag [#allocation6], %s244_s13 }
  0x20   : > { %s255_s25 = sshll.u32 %s248_s17, 4  ;;  %p1462_p4 = pneg %p1440_p0  ;;  %s1453_s25 = int_to_ptr.vmem [resolvable:$true] %s255_s25 }
  0x24   : > { %s1449_s16 = scalar_lea.hbm %s1739_s1, %s1436_s11  ;;  %s1115_s17 = scalar_lea.hbm %s1739_s1, 512 }
  0x25   : > { %s1110_s28 = scalar_lea.hbm %s1449_s16, 256  ;;  %p1116_p7 = scmp.lt.u32.totalorder %s1449_s16, %s1739_s1 }
  0x26   : > { %p1111_p3 = scmp.ne.s32.totalorder %s1449_s16, %s1110_s28  ;;  %p1117_p10 = scmp.lt.u32.totalorder %s1115_s17, %s1110_s28 }
  0x27   : > { %p1119_p12 = scmp.lt.u32.totalorder %s1110_s28, %s1449_s16 }
  0x28   : > { %p1113_p5 = pnand %p1462_p4, %p1111_p3  ;;  %p1118_p13 = por %p1117_p10, %p1116_p7 }
  0x2a   : > { %p1114_p6 = pneg %p1113_p5  ;;  %p1120_p1 = por %p1119_p12, %p1118_p13 }
  0x2c   : > { %p1121_p2 = pnand %p1120_p1, %p1114_p6 }
  0x2e   : > { %1124 = shalt.err (!%p1121_p2)
}
  0x2f   : > { %s1125_s13 = scalar_lea.vmem %s1453_s25, 256  ;;  %s1320_s14 = smov [#allocation5]  }
  0x30   : > { %p1126_p3 = scmp.ne.s32.totalorder %s1453_s25, %s1125_s13  ;;  %s1130_s15 = sshll.u32 %s1320_s14, 4  ;;  %s1131_s15 = int_to_ptr.vmem [resolvable:$false] %s1130_s15 }
  0x31   : > { %s1132_s26 = scalar_lea.vmem %s1131_s15, 512  ;;  %p1133_p9 = scmp.lt.s32.totalorder %s1453_s25, %s1131_s15 }
  0x32   : > { %p1128_p5 = pnand %p1126_p3, %p1462_p4  ;;  %p1134_p8 = scmp.lt.s32.totalorder %s1132_s26, %s1125_s13 }
  0x34   : > { %p1129_p11 = pneg %p1128_p5  ;;  %p1135_p7 = por %p1134_p8, %p1133_p9 }
  0x36   : > { %p1136_p10 = pnand %p1135_p7, %p1129_p11 }
  0x38   : > { %1139 = shalt.err (!%p1136_p10)
}
  0x39   : > { %s1720_s9 = smov 128   ;;  %s1722_s28 = smov 8  }
  0x3a   : > { %1034 = dma.hbm_to_vmem [thread:$0]  (!%p1440_p0), %s1449_s16, 256, %s1453_s25, %s1456_s27, %s1720_s9, %s1720_s9, %s1722_s28  }
  0x3b   : > { %p1741_p8 = scmp.lt.s32.totalorder %s1318_s23, 3  ;;  %p1742_p9 = scmp.ge.s32.totalorder %s1318_s23, 1 }
  0x3c   : > { %s1501_s15 = scalar_lea.hbm %s1710_s0, %s1436_s11  ;;  %s226_s26 = scalar_lea.vmem [#allocation2], %s1433_s10 }
  0x3d   : > { %p1493_p11 = pnand %p1742_p9, %p1741_p8  ;;  %s234_s1 = sshll.u32 %s226_s26, 4  ;;  %s1504_s1 = int_to_ptr.vmem [resolvable:$true] %s234_s1 }
  0x3e   : > { %s1510_s9 = scalar_lea.hbm %s1712_s2, %s1436_s11  ;;  %s1744_s28 = sand.u32 1, %s1306_s20  }
  0x3f   : > { %s1743_s17 = scalar_select %p1493_p11, 1, 0 }
  0x40   : > { %s1514_s22 = scalar_lea.sflag [#allocation3], %s1744_s28  ;;  %s1140_s7 = scalar_lea.hbm %s1501_s15, 256 }
  0x41   : > { %p1141_p12 = scmp.ne.s32.totalorder %s1501_s15, %s1140_s7  ;;  %s1145_s23 = scalar_lea.hbm %s1710_s0, 512 }
  0x42   : > { %p1146_p6 = scmp.lt.u32.totalorder %s1501_s15, %s1710_s0  ;;  %p1147_p13 = scmp.lt.u32.totalorder %s1145_s23, %s1140_s7 }
  0x43   : > { %p1143_p1 = pnand %p1141_p12, %p1462_p4  ;;  %p1149_p5 = scmp.lt.u32.totalorder %s1140_s7, %s1501_s15 }
  0x44   : > { %p1148_p3 = por %p1147_p13, %p1146_p6 }
  0x45   : > { %p1144_p2 = pneg %p1143_p1 }
  0x46   : > { %p1150_p7 = por %p1149_p5, %p1148_p3 }
  0x48   : > { %p1151_p10 = pnand %p1150_p7, %p1144_p2 }
  0x4a   : > { %1154 = shalt.err (!%p1151_p10)
}
  0x4b   : > { %s1155_s11 = scalar_lea.vmem %s1504_s1, 256  ;;  %s1323_s28 = smov [#allocation2]  }
  0x4c   : > { %p1156_p8 = scmp.ne.s32.totalorder %s1504_s1, %s1155_s11  ;;  %s1160_s16 = sshll.u32 %s1323_s28, 4  ;;  %s1161_s16 = int_to_ptr.vmem [resolvable:$false] %s1160_s16 }
  0x4d   : > { %s1162_s8 = scalar_lea.vmem %s1161_s16, 512  ;;  %p1163_p1 = scmp.lt.s32.totalorder %s1504_s1, %s1161_s16 }
  0x4e   : > { %p1158_p9 = pnand %p1156_p8, %p1462_p4  ;;  %p1164_p11 = scmp.lt.s32.totalorder %s1162_s8, %s1155_s11 }
  0x50   : > { %p1159_p12 = pneg %p1158_p9  ;;  %p1165_p6 = por %p1164_p11, %p1163_p1 }
  0x52   : > { %p1166_p13 = pnand %p1165_p6, %p1159_p12 }
  0x54   : > { %1169 = shalt.err (!%p1166_p13)
}
  0x55   : > { %s1745_s23 = smov 8   ;;  %s1746_s7 = smov 128  }
  0x56   : > { %1031 = dma.hbm_to_vmem [thread:$0]  (!%p1440_p0), %s1501_s15, 256, %s1504_s1, %s1514_s22, %s1746_s7, %s1746_s7, %s1745_s23  }
  0x57   : > { %s269_s25 = scalar_lea.vmem [#allocation7], %s1433_s10  ;;  %s1170_s14 = scalar_lea.hbm %s1510_s9, 256 }
  0x58   : > { %s276_s13 = sshll.u32 %s269_s25, 4  ;;  %p1171_p11 = scmp.ne.s32.totalorder %s1510_s9, %s1170_s14  ;;  %s1542_s13 = int_to_ptr.vmem [resolvable:$true] %s276_s13 }
  0x59   : > { %s1175_s28 = scalar_lea.hbm %s1712_s2, 512  ;;  %p1176_p5 = scmp.lt.u32.totalorder %s1510_s9, %s1712_s2 }
  0x5a   : > { %p1173_p2 = pnand %p1171_p11, %p1462_p4  ;;  %p1177_p7 = scmp.lt.u32.totalorder %s1175_s28, %s1170_s14 }
  0x5b   : > { %p1179_p8 = scmp.lt.u32.totalorder %s1170_s14, %s1510_s9 }
  0x5c   : > { %p1174_p3 = pneg %p1173_p2  ;;  %p1178_p10 = por %p1177_p7, %p1176_p5 }
  0x5e   : > { %p1180_p9 = por %p1179_p8, %p1178_p10 }
  0x60   : > { %p1181_p12 = pnand %p1180_p9, %p1174_p3 }
  0x62   : > { %1184 = shalt.err (!%p1181_p12)
}
  0x63   : > { %s1185_s1 = scalar_lea.vmem %s1542_s13, 256  ;;  %s1324_s22 = smov [#allocation7]  }
  0x64   : > { %p1186_p1 = scmp.ne.s32.totalorder %s1542_s13, %s1185_s1  ;;  %s1190_s10 = sshll.u32 %s1324_s22, 4  ;;  %s1191_s10 = int_to_ptr.vmem [resolvable:$false] %s1190_s10 }
  0x65   : > { %s1192_s15 = scalar_lea.vmem %s1191_s10, 512  ;;  %p1193_p11 = scmp.lt.s32.totalorder %s1542_s13, %s1191_s10 }
  0x66   : > { %p1188_p6 = pnand %p1186_p1, %p1462_p4  ;;  %p1194_p2 = scmp.lt.s32.totalorder %s1192_s15, %s1185_s1 }
  0x68   : > { %p1189_p13 = pneg %p1188_p6  ;;  %p1195_p5 = por %p1194_p2, %p1193_p11 }
  0x6a   : > { %p1196_p7 = pnand %p1195_p5, %p1189_p13 }
  0x6c   : > { %1199 = shalt.err (!%p1196_p7)
}
  0x6d   : > { %1037 = dma.hbm_to_vmem [thread:$0]  (!%p1440_p0), %s1510_s9, 256, %s1542_s13, %s1456_s27, %s1746_s7, %s1746_s7, %s1745_s23  }
  0x6e   : > { %p1747_p4 = scmp.ne.s32.totalorder %s1743_s17, 0 }
  0x6f   : > { %s1572_s29 = sand.u32 (!%p1747_p4), 1, %s1302_s19   ;;  %p1748_p3 = scmp.ne.s32.totalorder (!%p1747_p4), %s1733_s30, 0 }
  0x70   : > { %300 = sbr.rel (%p1747_p4) target bundleno = 886 (0x376), region = 36  ;;  %s1575_s25 = sshll.u32 (!%p1747_p4), %s1572_s29, 4 }
  0x71   : > { %s303_s12 = scalar_lea.sflag (!%p1747_p4), [#allocation3], %s1572_s29  ;;  %s306_s14 = scalar_lea.vmem (!%p1747_p4), [#allocation2], %s1575_s25 }
  0x77   : > { %1281 = dma.done.wait (%p1748_p3), %s303_s12, 256  }
  0x78   : > { %1283 = vsyncadd (%p1748_p3), %s303_s12, 4294967040  ;;  %s311_s27 = sand.u32 1, %s1393_s24   ;;  %s315_s17 = scalar_lea.vmem [#allocation5], %s1575_s25 }
  0x79   : > { %s312_s9 = scalar_lea.sflag [#allocation6], %s311_s27 }
  0x7a   : > { %1285 = dma.done.wait (%p1748_p3), %s312_s9, 512  }
  0x7b   : > { %1287 = vsyncadd (%p1748_p3), %s312_s9, 4294966784  ;;  %v1325_v0 = vmov 0.0   ;;  %vm1326_vm0 = vmmov 0   ;;  %vm400_vm1 = vcmask 261120   ;;  %v392_v1 = vld [vmem:[%s315_s17] sm:$0xff]  ;;  %v393_v3 = vld [vmem:[%s315_s17 + $0x8] sm:$0xff] }
  0x7c   : > { %998 = vmatprep.subr.mxu0 %v1325_v0  ;;  %1000 = vmatprep.mubr.msk.f32.mxu0 %vm1326_vm0, %v1325_v0  ;;  %v390_v2 = vld [vmem:[%s306_s14] sm:$0xff]  ;;  %v391_v5 = vld [vmem:[%s306_s14 + $0x8] sm:$0xff]  ;;  %s969_s24 = sshll.u32 %s1310_s21, 1  ;;  %v1327_v9 = vmov 0   ;;  %vm563_vm6 = vcmask 64512   ;;  %s324_s26 = scalar_lea.vmem [#allocation7], %s1575_s25 }
  0x7d   : > { %1003 = vmatprep.subr.mxu1 %v1325_v0  ;;  %1005 = vmatprep.mubr.msk.f32.mxu1 %vm1326_vm0, %v1325_v0  ;;  %v398_v4 = vmul.f32 0.17677669, %v390_v2  ;;  %v399_v6 = vmul.f32 0.17677669, %v391_v5  ;;  %p378_p0 = scmp.lt.s32.totalorder %s969_s24, 3  ;;  %v394_v32 = vld [vmem:[%s324_s26] sm:$0xff] }
  0x7e   : > { %999 = vmatpush3.xpose.msk.msra.mxu0 %vm400_vm1, %v392_v1  ;;  %1004 = vmatpush3.xpose.msk.msra.mxu1 %vm400_vm1, %v393_v3  ;;  %v395_v33 = vld [vmem:[%s324_s26 + $0x8] sm:$0xff]  ;;  %s373_s11 = scalar_lea.vmem [#allocation9], %s1575_s25  ;;  %s988_s28 = sshll.u32 %s1310_s21, 8 }
  0x7f   : > { %1008 = vmatprep.subr.mxu0 %v1325_v0  ;;  %1013 = vmatprep.subr.mxu1 %v1325_v0  ;;  %s1763_s24 = smov (!%p378_p0, %s969_s24), 3  ;;  %s773_s16 = sshll.u32 %s373_s11, 4  ;;  %s1619_s16 = int_to_ptr.vmem [resolvable:$true] %s773_s16 }
  0x80   : > { %s970_s30 = sshll.u32 %s1763_s24, 1  ;;  %s1617_s22 = scalar_lea.hbm %s1715_s5, %s988_s28 }
  0x81   : > { %1001 = vmatmul.mubr.msk.f32.vlgmr.msra.gmra.mrb[0].mxu0 %vm400_vm1, %v398_v4  ;;  %1006 = vmatmul.mubr.msk.f32.vlgmr.msra.gmra.mrb[0].mxu1 %vm400_vm1, %v399_v6  ;;  %s384_s13 = scalar_lea.vmem %s1713_s3, %s970_s30  ;;  %s742_s10 = scalar_lea.sflag [#allocation10], %s1572_s29 }
  0x82   : > { %1010 = vmatprep.mubr.msk.f32.mxu0 %vm1326_vm0, %v1325_v0  ;;  %1015 = vmatprep.mubr.msk.f32.mxu1 %vm1326_vm0, %v1325_v0  ;;  %v396_v7 = vld [vmem:[%s384_s13] sm:$0x3]  ;;  %v397_v8 = vld [vmem:[%s384_s13 + $0x2] sm:$0x3]  ;;  %s1200_s15 = scalar_lea.vmem %s1619_s16, 256  ;;  %p1749_p8 = scmp.ne.s32.totalorder %s1734_s6, 0 }
  0x83   : > { %vm553_vm2 = vnez %v396_v7  ;;  %vm554_vm3 = vnez %v397_v8  ;;  %1009 = vmatpush3.msra.mxu0 %v394_v32  ;;  %1014 = vmatpush3.msra.mxu1 %v395_v33  ;;  %p1201_p10 = scmp.ne.s32.totalorder %s1619_s16, %s1200_s15  ;;  %s1328_s12 = smov [#allocation9]  }
  0x84   : > { %v555_v10 = vsel %vm553_vm2, 16843009, %v1327_v9  ;;  %v556_v11 = vsel %vm554_vm3, 16843009, %v1327_v9  ;;  %s1204_s14 = sshll.u32 %s1328_s12, 4  ;;  %s1205_s14 = int_to_ptr.vmem [resolvable:$false] %s1204_s14 }
  0x85   : > { %v557_v12 = vunpack.c.0.s8 %v555_v10  ;;  %v558_v13 = vunpack.c.0.s8 %v556_v11  ;;  %p1202_p9 = pnand %p1201_p10, %p1749_p8  ;;  %s1206_s27 = scalar_lea.vmem %s1205_s14, 512 }
  0x86   : > { %p1207_p1 = scmp.lt.s32.totalorder %s1619_s16, %s1205_s14  ;;  %p1208_p6 = scmp.lt.s32.totalorder %s1206_s27, %s1200_s15 }
  0x87   : > { %vm559_vm4 = vcmp.ne.s32.totalorder %v557_v12, 0  ;;  %vm560_vm5 = vcmp.ne.s32.totalorder %v558_v13, 0  ;;  %p1203_p12 = pneg %p1202_p9 }
  0x88   : > { %p1209_p13 = por %p1208_p6, %p1207_p1 }
  0x8a   : > { %p1210_p11 = pnand %p1209_p13, %p1203_p12 }
 0x154   : > { %v473_v14 = vpop.f32.mrb[0].mxu0  ;;  %v549_v15 = vpop.f32.mrb[0].mxu1 }
 0x155   : > { %v561_v16 = vsel %vm559_vm4, -inf, %v473_v14  ;;  %v1002_v17 = vpop.f32.mrb[1].mxu0  ;;  %v562_v18 = vsel %vm560_vm5, -inf, %v549_v15  ;;  %v1007_v19 = vpop.f32.mrb[1].mxu1 }
 0x156   : > { %v564_v20 = vsel %vm563_vm6, %v561_v16, -inf  ;;  %v567_v21 = vsel %vm563_vm6, %v562_v18, -inf }
 0x157   : > { %565 = vmax.xlane.f32.xlu0 %v564_v20 }
 0x15b   : > { %568 = vmax.xlane.f32.xlu0 %v567_v21 }
 0x1e4   : > { %v566_v22 = vpop.xlane.xlu0 %565 }
 0x1e5   : > { %v570_v23 = vsub.f32 %v561_v16, %v566_v22 }
 0x1e7   : > { %v572_v24 = vmul.f32 1.442695, %v570_v23 }
 0x1e8   : > { %v569_v25 = vpop.xlane.xlu0 %568 }
 0x1e9   : > { %1102 = vpow2.f32 %v572_v24  ;;  %v571_v26 = vsub.f32 %v562_v18, %v569_v25 }
 0x1eb   : > { %v574_v27 = vmul.f32 1.442695, %v571_v26 }
 0x1ed   : > { %1104 = vpow2.f32 %v574_v27 }
 0x1f3   : > { %v1103_v28 = vpop.eup %1102 }
 0x1f4   : > { %v576_v29 = vsel %vm563_vm6, %v1103_v28, 0.0 }
 0x1f5   : > { %577 = vadd.xlane.f32.xlu1 %v576_v29 }
 0x1f7   : > { %v1105_v30 = vpop.eup %1104 }
 0x1f8   : > { %v579_v31 = vsel %vm563_vm6, %v1105_v30, 0.0 }
 0x1f9   : > { %580 = vadd.xlane.f32.xlu1 %v579_v31 }
 0x282   : > { %v578_v34 = vpop.xlane.xlu1 %577 }
 0x283   : > { %1106 = vrcp.f32 %v578_v34 }
 0x286   : > { %v581_v35 = vpop.xlane.xlu1 %580 }
 0x287   : > { %1108 = vrcp.f32 %v581_v35 }
 0x28d   : > { %v1107_v36 = vpop.eup %1106 }
 0x28e   : > { %v584_v37 = vmul.f32 %v1107_v36, %v1103_v28 }
 0x290   : > { %1011 = vmatmul.mubr.msk.f32.vlgmr.msra.gmra.mrb[2].mxu0 %vm563_vm6, %v584_v37  ;;  %734 = vst.msk [vmem:[%s373_s11] sm:$0xff] %vm563_vm6, %v584_v37 }
 0x291   : > { %v1109_v38 = vpop.eup %1108 }
 0x292   : > { %v585_v39 = vmul.f32 %v1109_v38, %v1105_v30 }
 0x294   : > { %1016 = vmatmul.mubr.msk.f32.vlgmr.msra.gmra.mrb[2].mxu1 %vm563_vm6, %v585_v39  ;;  %735 = vst.msk [vmem:[%s373_s11 + $0x8] sm:$0xff] %vm563_vm6, %v585_v39 }
 0x295   : > { %1213 = shalt.err (!%p1210_p11)
}
 0x296   : > { %s1214_s9 = scalar_lea.hbm %s1617_s22, 256  ;;  %s1218_s30 = scalar_lea.hbm %s1715_s5, 512 }
 0x297   : > { %p1215_p2 = scmp.ne.s32.totalorder %s1617_s22, %s1214_s9  ;;  %p1219_p4 = scmp.lt.u32.totalorder %s1617_s22, %s1715_s5 }
 0x298   : > { %p1220_p3 = scmp.lt.u32.totalorder %s1218_s30, %s1214_s9  ;;  %p1222_p10 = scmp.lt.u32.totalorder %s1214_s9, %s1617_s22 }
 0x299   : > { %p1216_p5 = pnand %p1215_p2, %p1749_p8 }
 0x29a   : > { %p1221_p0 = por %p1220_p3, %p1219_p4 }
 0x29b   : > { %p1217_p7 = pneg %p1216_p5 }
 0x29c   : > { %p1223_p9 = por %p1222_p10, %p1221_p0 }
 0x29e   : > { %p1224_p12 = pnand %p1223_p9, %p1217_p7 }
 0x2a0   : > { %1227 = shalt.err (!%p1224_p12)
}
 0x2a1   : > { %s1329_s13 = smov 128   ;;  %s1330_s26 = smov 8  }
 0x2a2   : > { %1025 = dma.vmem_to_hbm [thread:$0]  (%p1749_p8), %s1619_s16, 256, %s1617_s22, %s742_s10, %s1329_s13, %s1329_s13, %s1330_s26  }
 0x2a3   : > { %s366_s11 = scalar_lea.vmem [#allocation8], %s1575_s25  ;;  %s1657_s12 = scalar_lea.hbm %s1714_s4, %s988_s28 }
 0x2a4   : > { %s756_s8 = sshll.u32 %s366_s11, 4  ;;  %s737_s25 = scalar_lea.sflag [#allocation4], %s1572_s29  ;;  %s1650_s8 = int_to_ptr.vmem [resolvable:$true] %s756_s8 }
 0x2a5   : > { %s1228_s16 = scalar_lea.vmem %s1650_s8, 256  ;;  %s1331_s22 = smov [#allocation8]  }
 0x2a6   : > { %p1229_p1 = scmp.ne.s32.totalorder %s1650_s8, %s1228_s16  ;;  %s1232_s21 = sshll.u32 %s1331_s22, 4  ;;  %s1233_s21 = int_to_ptr.vmem [resolvable:$false] %s1232_s21 }
 0x2a7   : > { %s1234_s10 = scalar_lea.vmem %s1233_s21, 512  ;;  %p1235_p11 = scmp.lt.s32.totalorder %s1650_s8, %s1233_s21 }
 0x2a8   : > { %p1230_p6 = pnand %p1229_p1, %p1749_p8  ;;  %p1236_p2 = scmp.lt.s32.totalorder %s1234_s10, %s1228_s16 }
 0x2aa   : > { %p1231_p13 = pneg %p1230_p6  ;;  %p1237_p5 = por %p1236_p2, %p1235_p11 }
 0x2ac   : > { %p1238_p7 = pnand %p1237_p5, %p1231_p13 }
 0x363   : > { %v655_v40 = vpop.f32.mrb[2].mxu0 }
 0x364   : > { %732 = vst.msk [vmem:[%s366_s11] sm:$0xff] %vm400_vm1, %v655_v40  ;;  %v1012_v41 = vpop.f32.mrb[3].mxu0 }
 0x367   : > { %v728_v42 = vpop.f32.mrb[2].mxu1 }
 0x368   : > { %733 = vst.msk [vmem:[%s366_s11 + $0x8] sm:$0xff] %vm400_vm1, %v728_v42  ;;  %v1017_v43 = vpop.f32.mrb[3].mxu1 }
 0x369   : > { %1241 = shalt.err (!%p1238_p7)
}
 0x36a   : > { %s1242_s28 = scalar_lea.hbm %s1657_s12, 256  ;;  %s1246_s9 = scalar_lea.hbm %s1714_s4, 512 }
 0x36b   : > { %p1243_p4 = scmp.ne.s32.totalorder %s1657_s12, %s1242_s28  ;;  %p1247_p10 = scmp.lt.u32.totalorder %s1657_s12, %s1714_s4 }
 0x36c   : > { %p1248_p9 = scmp.lt.u32.totalorder %s1246_s9, %s1242_s28  ;;  %p1250_p1 = scmp.lt.u32.totalorder %s1242_s28, %s1657_s12 }
 0x36d   : > { %p1244_p3 = pnand %p1243_p4, %p1749_p8 }
 0x36e   : > { %p1249_p12 = por %p1248_p9, %p1247_p10 }
 0x36f   : > { %p1245_p0 = pneg %p1244_p3 }
 0x370   : > { %p1251_p6 = por %p1250_p1, %p1249_p12 }
 0x372   : > { %p1252_p13 = pnand %p1251_p6, %p1245_p0 }
 0x374   : > { %1255 = shalt.err (!%p1252_p13)
}
 0x375   : > { %1024 = dma.vmem_to_hbm [thread:$0]  (%p1749_p8), %s1650_s8, 256, %s1657_s12, %s737_s25, %s1329_s13, %s1329_s13, %s1330_s26  }
 0x376 PF: > { %s1750_s30 = sld [smem:[#allocation19_spill]]  ;;  %s1751_s23 = sld [smem:[#allocation16_spill]] }
 0x377   : > { %s788_s7 = sand.u32 1, %s1298_s18  }
 0x378   : > { %s789_s11 = scalar_lea.sflag [#allocation4], %s788_s7 }
 0x37c   : > { %p1752_p11 = scmp.ne.s32.totalorder %s1750_s30, 0  ;;  %p1753_p2 = scmp.ge.s32.totalorder %s1751_s23, 2 }
 0x37e   : > { %p1039_p5 = pnand %p1753_p2, %p1752_p11 }
 0x380   : > { %1289 = dma.done.wait (!%p1039_p5), %s789_s11, 256  }
 0x381   : > { %1291 = vsyncadd (!%p1039_p5), %s789_s11, 4294967040  ;;  %s798_s6 = scalar_lea.sflag [#allocation10], %s788_s7 }
 0x382   : > { %1293 = dma.done.wait (!%p1039_p5), %s798_s6, 256  }
 0x383   : > { %1295 = vsyncadd (!%p1039_p5), %s798_s6, 4294967040  ;;  %s28_s23 = sadd.s32 1, %s1751_s23   ;;  %s1754_s29 = sld [smem:[#allocation18_spill]] }
 0x384   : > { %p25_p7 = scmp.ge.s32.totalorder %s28_s23, 4   ;;  %s1755_s21 = sld [smem:[#allocation15_spill]] }
 0x385   : > { %s1756_s22 = sld [smem:[#allocation17_spill]]  ;;  %s1757_s18 = smov %s1302_s19 }
 0x386   : > { %s1758_s19 = smov %s1306_s20  ;;  %27 = sbr.rel (!%p25_p7) target bundleno = 12 (0xc), region = 125 }
 0x389   : > { %s1759_s20 = smov %s1754_s29 }
 0x38d   :  { %803 = vsyncpa [#allocation3], 1 }
 0x38e   :  { %805 = vsyncpa [#allocation3 + $0x1], 1 }
 0x38f   :  { %806 = vsyncpa [#allocation6], 1 }
 0x390   :  { %808 = vsyncpa [#allocation6 + $0x1], 1 }
 0x391   :  { %809 = vsyncpa [#allocation4], 1 }
 0x392   :  { %811 = vsyncpa [#allocation4 + $0x1], 1 }
 0x393   :  { %812 = vsyncpa [#allocation10], 1 }
 0x394   :  { %814 = vsyncpa [#allocation10 + $0x1], 1 }

</bundles_post_ra>
